<compile_context>
chip_gen: v7x
topology: tpu7x:2x2x1
jax: 0.10.0
libtpu: 0.0.40
codegen_flags: <defaults>
</compile_context>

<pallas_src>
import functools

import jax
import jax.numpy as jnp
from jax.experimental import pallas as pl
from jax.experimental.pallas import tpu as pltpu

NUM_FILTERS = 100
FILTER_SIZES = (3, 4, 5)
F_PAD = 128                           # per-branch filter lanes, padded to a lane width
N_OUT = len(FILTER_SIZES) * F_PAD     # 384 — lane-dense fused output width
S_MAX = max(FILTER_SIZES)             # 5


def _textcnn_fused_kernel(x_ref, w_ref, b_ref, lim_ref, o_ref, *, seq_len, hidden, bt):
    """All three conv branches + global max-pool + bias for one batch tile.

    x_ref:   (Bt, L, H)        activations (f32 or bf16)
    w_ref:   (S_MAX*H, 384)    packed conv weights (zero rows for missing taps)
    b_ref:   (1, 384)          packed biases (f32)
    lim_ref: (1, 384)          valid time-step count per output column (L - s + 1)
    o_ref:   (Bt, 384)         pooled outputs (f32)
    """
    m_total = bt * seq_len
    x = x_ref[...].reshape(m_total, hidden)              # (Bt*L, H) — L mult. of 8: clean

    # im2col: windows[m, k*H:(k+1)*H] = x[m + k]; rows wrap around the batch tile,
    # but wrapped rows only ever meet zero weight taps or masked-out time steps.
    taps = [x]
    for k in range(1, S_MAX):
        taps.append(jnp.concatenate([x[k:, :], x[:k, :]], axis=0))
    windows = jnp.concatenate(taps, axis=-1)              # (Bt*L, S_MAX*H)

    # Single fused matmul: M = Bt*L, K = S_MAX*H, N = 384 (f32 accumulation on MXU).
    conv = jnp.dot(windows, w_ref[...], preferred_element_type=jnp.float32)
    conv = conv.reshape(bt, seq_len, N_OUT)               # (Bt, L, 384)

    # Mask invalid sliding-window positions per branch, then global max over time.
    t_idx = jax.lax.broadcasted_iota(jnp.int32, (bt, seq_len, N_OUT), 1)
    conv = jnp.where(t_idx < lim_ref[...], conv, -jnp.inf)
    pooled = jnp.max(conv, axis=1)                        # (Bt, 384), f32

    o_ref[...] = (pooled + b_ref[...]).astype(o_ref.dtype)


def prepare_params(params, *, hidden, compute_dtype=jnp.float32):
    """One-time packing of the three Conv2d weights/biases (hoisted off the hot path).

    params[s] = (w, b) with w: (NUM_FILTERS, s, hidden), b: (NUM_FILTERS,).
    Returns w_pack (S_MAX*hidden, 384) and b_pack (1, 384).
    """
    w_pack = jnp.zeros((S_MAX * hidden, N_OUT), compute_dtype)
    b_pack = jnp.zeros((1, N_OUT), jnp.float32)
    for j, s in enumerate(FILTER_SIZES):
        w, b = params[s]
        # (F, s, H) -> (s, H, F) -> (s*H, F); row index = tap*H + h matches im2col layout.
        w_t = jnp.transpose(w, (1, 2, 0)).reshape(s * hidden, NUM_FILTERS)
        col = j * F_PAD
        w_pack = w_pack.at[: s * hidden, col: col + NUM_FILTERS].set(
            w_t.astype(compute_dtype))
        b_pack = b_pack.at[0, col: col + NUM_FILTERS].set(b.astype(jnp.float32))
    return w_pack, b_pack


@functools.partial(jax.jit, static_argnames=("batch_tile",))
def textcnn_forward(x, w_pack, b_pack, *, batch_tile=8):
    """x: (B, L, H) f32 -> (B, 3*NUM_FILTERS), matching the PyTorch TextCNN forward."""
    B, L, H = x.shape
    assert L >= S_MAX, "sequence length must be >= largest filter size"
    compute_dtype = w_pack.dtype
    x = x.astype(compute_dtype)                 # bf16 cast halves x HBM/VMEM traffic

    bt = batch_tile
    b_padded = pl.cdiv(B, bt) * bt
    if b_padded != B:                           # tail handling: pad batch with zero rows
        x = jnp.pad(x, ((0, b_padded - B), (0, 0), (0, 0)))

    # valid time-step count (L - s + 1) for each of the 384 output columns
    limits = jnp.concatenate(
        [jnp.full((1, F_PAD), L - s + 1, jnp.int32) for s in FILTER_SIZES], axis=1)

    kernel = functools.partial(_textcnn_fused_kernel, seq_len=L, hidden=H, bt=bt)

    out = pl.pallas_call(
        kernel,
        out_shape=jax.ShapeDtypeStruct((b_padded, N_OUT), jnp.float32),
        grid_spec=pltpu.PrefetchScalarGridSpec(
            num_scalar_prefetch=0,
            grid=(b_padded // bt,),
            in_specs=[
                pl.BlockSpec((bt, L, H), lambda i: (i, 0, 0)),        # x batch tile
                pl.BlockSpec((S_MAX * H, N_OUT), lambda i: (0, 0)),   # packed weights
                pl.BlockSpec((1, N_OUT), lambda i: (0, 0)),           # packed bias
                pl.BlockSpec((1, N_OUT), lambda i: (0, 0)),           # time limits
            ],
            out_specs=pl.BlockSpec((bt, N_OUT), lambda i: (i, 0)),
        ),
        compiler_params=pltpu.CompilerParams(
            dimension_semantics=("parallel",)),   # batch tiles shard across TCs (v7x)
    )(x, w_pack, b_pack, limits)

    out = out[:B]
    # drop the per-branch lane padding (cols 100..127 of each 128-lane block)
    return jnp.concatenate(
        [out[:, j * F_PAD: j * F_PAD + NUM_FILTERS] for j in range(len(FILTER_SIZES))],
        axis=1)


def textcnn_reference(x, params):
    """Plain-JAX reference for correctness checking."""
    B, L, H = x.shape
    outs = []
    for s in FILTER_SIZES:
        w, b = params[s]                                   # (F, s, H), (F,)
        t_out = L - s + 1
        conv = jnp.zeros((B, t_out, NUM_FILTERS), jnp.float32)
        for k in range(s):
            conv += jnp.einsum('blh,fh->blf', x[:, k:k + t_out, :], w[:, k, :])
        conv = conv + b[None, None, :]
        outs.append(jnp.max(conv, axis=1))                 # (B, F)
    return jnp.concatenate(outs, axis=1)


if __name__ == "__main__":
    # Small deterministic shapes: batch=2, seq=16, hidden=32.
    B, L, H = 2, 16, 32
    key = jax.random.PRNGKey(0)
    kx, *kws = jax.random.split(key, 1 + 2 * len(FILTER_SIZES))

    x = jax.random.normal(kx, (B, L, H), dtype=jnp.float32)

    params = {}
    for i, s in enumerate(FILTER_SIZES):
        kw, kb = kws[2 * i], kws[2 * i + 1]
        w = 0.05 * jax.random.normal(kw, (NUM_FILTERS, s, H), dtype=jnp.float32)
        b = 0.05 * jax.random.normal(kb, (NUM_FILTERS,), dtype=jnp.float32)
        params[s] = (w, b)

    ref = jax.block_until_ready(textcnn_reference(x, params))

    # f32 path
    w32, b32 = prepare_params(params, hidden=H, compute_dtype=jnp.float32)
    out_f32 = jax.block_until_ready(textcnn_forward(x, w32, b32))
    assert out_f32.shape == (B, 3 * NUM_FILTERS), out_f32.shape
    assert jnp.allclose(out_f32, ref, atol=1e-3, rtol=1e-3), "f32 kernel mismatch vs reference"

    # bf16-input / f32-accumulate fast path (v6e/v7x MXU peak)
    wbf, bbf = prepare_params(params, hidden=H, compute_dtype=jnp.bfloat16)
    out_bf16 = jax.block_until_ready(textcnn_forward(x, wbf, bbf))
    assert out_bf16.shape == (B, 3 * NUM_FILTERS), out_bf16.shape
    assert jnp.allclose(out_bf16, ref, atol=3e-2, rtol=3e-2), "bf16 kernel mismatch vs reference"

    print("KERNEL_OK")
</pallas_src>

<mosaic_0001>
module attributes {stable_mosaic.version = 11 : i64} {
  func.func @_textcnn_fused_kernel(%arg0: i32, %arg1: memref<8x16x32xf32, #tpu.memory_space<vmem>>, %arg2: memref<160x384xf32, #tpu.memory_space<vmem>>, %arg3: memref<1x384xf32, #tpu.memory_space<vmem>>, %arg4: memref<1x384xi32, #tpu.memory_space<vmem>>, %arg5: memref<8x384xf32, #tpu.memory_space<vmem>>) attributes {dimension_semantics = [#tpu.dimension_semantics<parallel>], iteration_bounds = array<i64: 1>, scalar_prefetch = 0 : i64, scratch_operands = 0 : i64, tpu.core_type = #tpu.core_type<tc>, window_params = [{transform_indices = @transform_0, window_bounds = array<i64: 8, 16, 32>}, {pipeline_mode = #tpu.pipeline_mode<synchronous>, transform_indices = @transform_1, window_bounds = array<i64: 160, 384>}, {pipeline_mode = #tpu.pipeline_mode<synchronous>, transform_indices = @transform_2, window_bounds = array<i64: 1, 384>}, {pipeline_mode = #tpu.pipeline_mode<synchronous>, transform_indices = @transform_3, window_bounds = array<i64: 1, 384>}, {transform_indices = @transform_4, window_bounds = array<i64: 8, 384>}]} {
    %c0 = arith.constant 0 : index
    %c0_0 = arith.constant 0 : index
    %c0_1 = arith.constant 0 : index
    %0 = vector.load %arg1[%c0, %c0_0, %c0_1] : memref<8x16x32xf32, #tpu.memory_space<vmem>>, vector<8x16x32xf32>
    %1 = vector.shape_cast %0 : vector<8x16x32xf32> to vector<128x32xf32>
    %2 = vector.extract_strided_slice %1 {offsets = [1, 0], sizes = [127, 32], strides = [1, 1]} : vector<128x32xf32> to vector<127x32xf32>
    %3 = vector.extract_strided_slice %1 {offsets = [0, 0], sizes = [1, 32], strides = [1, 1]} : vector<128x32xf32> to vector<1x32xf32>
    %4 = tpu.concatenate %2, %3 in 0 : vector<127x32xf32>, vector<1x32xf32> -> vector<128x32xf32>
    %5 = vector.extract_strided_slice %1 {offsets = [2, 0], sizes = [126, 32], strides = [1, 1]} : vector<128x32xf32> to vector<126x32xf32>
    %6 = vector.extract_strided_slice %1 {offsets = [0, 0], sizes = [2, 32], strides = [1, 1]} : vector<128x32xf32> to vector<2x32xf32>
    %7 = tpu.concatenate %5, %6 in 0 : vector<126x32xf32>, vector<2x32xf32> -> vector<128x32xf32>
    %8 = vector.extract_strided_slice %1 {offsets = [3, 0], sizes = [125, 32], strides = [1, 1]} : vector<128x32xf32> to vector<125x32xf32>
    %9 = vector.extract_strided_slice %1 {offsets = [0, 0], sizes = [3, 32], strides = [1, 1]} : vector<128x32xf32> to vector<3x32xf32>
    %10 = tpu.concatenate %8, %9 in 0 : vector<125x32xf32>, vector<3x32xf32> -> vector<128x32xf32>
    %11 = vector.extract_strided_slice %1 {offsets = [4, 0], sizes = [124, 32], strides = [1, 1]} : vector<128x32xf32> to vector<124x32xf32>
    %12 = vector.extract_strided_slice %1 {offsets = [0, 0], sizes = [4, 32], strides = [1, 1]} : vector<128x32xf32> to vector<4x32xf32>
    %13 = tpu.concatenate %11, %12 in 0 : vector<124x32xf32>, vector<4x32xf32> -> vector<128x32xf32>
    %14 = tpu.concatenate %1, %4, %7, %10, %13 in 1 : vector<128x32xf32>, vector<128x32xf32>, vector<128x32xf32>, vector<128x32xf32>, vector<128x32xf32> -> vector<128x160xf32>
    %c0_2 = arith.constant 0 : index
    %c0_3 = arith.constant 0 : index
    %15 = vector.load %arg2[%c0_2, %c0_3] : memref<160x384xf32, #tpu.memory_space<vmem>>, vector<160x384xf32>
    %cst = arith.constant dense<0.000000e+00> : vector<128x384xf32>
    %16 = tpu.matmul %14, %15, %cst {dimension_numbers = #tpu.dot_dimension_numbers<[1], [0], [0], [1], [0, 0, 1, 1], [], []>} : vector<128x160xf32>, vector<160x384xf32>, vector<128x384xf32> -> vector<128x384xf32>
    %17 = vector.shape_cast %16 : vector<128x384xf32> to vector<8x16x384xf32>
    %18 = tpu.iota {dimensions = array<i32: 1>} : vector<8x16x384xi32>
    %c0_4 = arith.constant 0 : index
    %c0_5 = arith.constant 0 : index
    %19 = vector.load %arg4[%c0_4, %c0_5] : memref<1x384xi32, #tpu.memory_space<vmem>>, vector<1x384xi32>
    %20 = vector.shape_cast %19 : vector<1x384xi32> to vector<1x1x384xi32>
    %21 = vector.broadcast %20 : vector<1x1x384xi32> to vector<8x16x384xi32>
    %22 = arith.cmpi slt, %18, %21 : vector<8x16x384xi32>
    %cst_6 = arith.constant 0xFF800000 : f32
    %23 = vector.broadcast %cst_6 : f32 to vector<8x16x384xf32>
    %24 = arith.select %22, %17, %23 : vector<8x16x384xi1>, vector<8x16x384xf32>
    %cst_7 = arith.constant dense<0xFF800000> : vector<8x384xf32>
    %25 = vector.multi_reduction <maximumf>, %24, %cst_7 [1] : vector<8x16x384xf32> to vector<8x384xf32>
    %c0_8 = arith.constant 0 : index
    %c0_9 = arith.constant 0 : index
    %26 = vector.load %arg3[%c0_8, %c0_9] : memref<1x384xf32, #tpu.memory_space<vmem>>, vector<1x384xf32>
    %27 = vector.broadcast %26 : vector<1x384xf32> to vector<8x384xf32>
    %28 = arith.addf %25, %27 : vector<8x384xf32>
    %c0_10 = arith.constant 0 : index
    %c0_11 = arith.constant 0 : index
    %29 = vector.load %arg5[%c0_10, %c0_11] : memref<8x384xf32, #tpu.memory_space<vmem>>, vector<8x384xf32>
    tpu.vector_store %arg5[%c0_10, %c0_11], %28 {strides = array<i32>} : memref<8x384xf32, #tpu.memory_space<vmem>>, vector<8x384xf32>,
    return
  }
  func.func @transform_0(%arg0: i32) -> (i32, i32, i32) {
    %c0_i32 = arith.constant 0 : i32
    %c0_i32_0 = arith.constant 0 : i32
    %c0_i32_1 = arith.constant 0 : i32
    return %arg0, %c0_i32, %c0_i32_0 : i32, i32, i32
  }
  func.func @transform_1(%arg0: i32) -> (i32, i32) {
    %c0_i32 = arith.constant 0 : i32
    %c0_i32_0 = arith.constant 0 : i32
    %c0_i32_1 = arith.constant 0 : i32
    return %c0_i32, %c0_i32_0 : i32, i32
  }
  func.func @transform_2(%arg0: i32) -> (i32, i32) {
    %c0_i32 = arith.constant 0 : i32
    %c0_i32_0 = arith.constant 0 : i32
    %c0_i32_1 = arith.constant 0 : i32
    return %c0_i32, %c0_i32_0 : i32, i32
  }
  func.func @transform_3(%arg0: i32) -> (i32, i32) {
    %c0_i32 = arith.constant 0 : i32
    %c0_i32_0 = arith.constant 0 : i32
    %c0_i32_1 = arith.constant 0 : i32
    return %c0_i32, %c0_i32_0 : i32, i32
  }
  func.func @transform_4(%arg0: i32) -> (i32, i32) {
    %c0_i32 = arith.constant 0 : i32
    %c0_i32_0 = arith.constant 0 : i32
    return %arg0, %c0_i32 : i32, i32
  }
}

</mosaic_0001>

<bundles_post_ra>
// kernel: textcnn_forward.1
= control target key start
LH: loop header
LB: loop body
LE: loop exit
PB: predicated region body
PF: predicated region fallthrough
CT: control target
= control target key end

     0   :  { %9 = vsyncpa [#allocation3], 0  ;;  %s1401_s15 = smov [#allocation2]   ;;  %s2041_s0 = inlined_call_operand.vmem [shape: f32[8,16,32], index: 0, kind: input, shape index: {}]   ;;  %s2042_s1 = inlined_call_operand.hbm [shape: f32[160,384], index: 1, kind: input, shape index: {}]   ;;  %s2043_s2 = inlined_call_operand.vmem [shape: f32[1,384], index: 2, kind: input, shape index: {}]   ;;  %s2044_s3 = inlined_call_operand.vmem [shape: s32[1,384], index: 3, kind: input, shape index: {}]   ;;  %s2045_s4 = inlined_call_operand.vmem [shape: f32[8,384], index: 4, kind: output, shape index: {}]  }
   0x1   :  { %s17_s16 = sshll.u32 %s1401_s15, 4  ;;  %s1377_s19 = scalar_lea.hbm %s2042_s1, 7680  ;;  %s18_s16 = int_to_ptr.vmem [resolvable:$true] %s17_s16 }
   0x2   :  { %p1378_p0 = scmp.ne.s32.totalorder %s2042_s1, %s1377_s19  ;;  %p1381_p1 = scmp.lt.u32.totalorder %s1377_s19, %s2042_s1 }
   0x4   :  { %p1383_p2 = pnand %p1381_p1, %p1378_p0 }
   0x6   :  { %1386 = shalt.err (!%p1383_p2)
}
   0x7   :  { %s1387_s24 = scalar_lea.vmem %s18_s16, 7680  ;;  %p1392_p4 = scmp.lt.s32.totalorder %s18_s16, %s18_s16 }
   0x8   :  { %p1388_p3 = scmp.ne.s32.totalorder %s18_s16, %s1387_s24  ;;  %p1393_p5 = scmp.lt.s32.totalorder %s1387_s24, %s1387_s24 }
   0xa   :  { %p1394_p6 = por %p1393_p5, %p1392_p4 }
   0xc   :  { %p1395_p7 = pnand %p1394_p6, %p1388_p3 }
   0xe   :  { %1398 = shalt.err (!%p1395_p7)
}
   0xf   :  { %s1402_s25 = smov 384   ;;  %s1403_s26 = smov 24  }
  0x10   :  { %23 = dma.hbm_to_vmem [thread:$0]  %s2042_s1, 7680, %s18_s16, [#allocation3], %s1402_s25, %s1402_s25, %s1403_s26  }
  0x11   :  { %1399 = dma.done.wait [#allocation3], 7680  }
  0x12   :  { %1400 = vsyncadd [#allocation3], 4294959616  ;;  %v1404_v0 = vmov 0.0|0.0   ;;  %v1449_v1 = vld [vmem:[%s2041_s0] sm:$0xff]  ;;  %v1454_v2 = vld [vmem:[%s2041_s0 + $0x8] sm:$0xff]  ;;  %vm63_vm0 = vcmask 1046528  }
  0x13   :  { %1235 = vmatprep.subr.bf16.mxu1 %v1404_v0  ;;  %v1459_v3 = vld [vmem:[%s2041_s0 + $0x10] sm:$0xff]  ;;  %vm133_vm1 = vcmask 1044480   ;;  %vm98_vm2 = vcmask 1045504   ;;  %v64_v4 = vrot.slane %v1449_v1, 1  ;;  %v65_v5 = vrot.slane %v1454_v2, 1  ;;  %v1468_v8 = vld [vmem:[%s2041_s0 + $0x18] sm:$0xff] }
  0x14   :  { %v67_v6 = vrot.slane %v1459_v3, 1  ;;  %v134_v7 = vrot.slane %v1449_v1, 3  ;;  %v135_v9 = vrot.slane %v1454_v2, 3  ;;  %v137_v10 = vrot.slane %v1459_v3, 3  ;;  %v1477_v13 = vld [vmem:[%s2041_s0 + $0x20] sm:$0xff]  ;;  %v1495_v22 = vld [vmem:[%s2041_s0 + $0x28] sm:$0xff] }
  0x15   :  { %v99_v11 = vrot.slane %v1449_v1, 2  ;;  %v100_v12 = vrot.slane %v1454_v2, 2  ;;  %v66_v14 = vsel %vm63_vm0, %v64_v4, %v65_v5  ;;  %v102_v16 = vrot.slane %v1459_v3, 2  ;;  %v1500_v23 = vld [vmem:[%s2041_s0 + $0x30] sm:$0xff]  ;;  %s1405_s16 = smov 32   ;;  %s1406_s17 = smov 96  }
  0x16   :  { %v68_v15 = vsel %vm63_vm0, %v65_v5, %v67_v6  ;;  %v69_v17 = vrot.slane %v1468_v8, 1  ;;  %v136_v19 = vsel %vm133_vm1, %v134_v7, %v135_v9  ;;  %v138_v20 = vsel %vm133_vm1, %v135_v9, %v137_v10  ;;  %v1521_v42 = vld [vmem:[%s2041_s0 + $0x38] sm:$0xff]  ;;  %v1526_v43 = vld [vmem:[%s2041_s0 + $0x40] sm:$0xff]  ;;  %s1407_s22 = smov 64   ;;  %v1549_v61 = vld [vmem:[%s2041_s0 + $0x48] sm:$0xff] }
  0x17   :  { %v1272_v18 = vpack.i.bf16 %v68_v15, %v66_v14  ;;  %v101_v21 = vsel %vm98_vm2, %v99_v11, %v100_v12  ;;  %v1282_v24 = vpack.i.bf16 %v138_v20, %v136_v19  ;;  %v103_v25 = vsel %vm98_vm2, %v100_v12, %v102_v16  ;;  %v1554_v62 = vld [vmem:[%s2041_s0 + $0x50] sm:$0xff]  ;;  %v1574_v19 = vld [vmem:[%s2041_s0 + $0x60] sm:$0xff] }
  0x18   :  { %v70_v26 = vsel %vm63_vm0, %v67_v6, %v69_v17  ;;  %v71_v27 = vrot.slane %v1477_v13, 1  ;;  %v1277_v28 = vpack.i.bf16 %v103_v25, %v101_v21  ;;  %v104_v29 = vrot.slane %v1468_v8, 2 }
  0x19   :  { %1273 = vrot.lane.b32.xlu0 %v1272_v18, %s1405_s16  ;;  %v106_v30 = vrot.slane %v1477_v13, 2  ;;  %v139_v31 = vrot.slane %v1468_v8, 3  ;;  %1283 = vrot.lane.b32.xlu1 %v1282_v24, %s1406_s17  ;;  %v141_v33 = vrot.slane %v1477_v13, 3  ;;  %v73_v34 = vrot.slane %v1495_v22, 1  ;;  %v1569_v18 = vld [vmem:[%s2041_s0 + $0x58] sm:$0xff] }
  0x1a   :  { %v72_v32 = vsel %vm63_vm0, %v69_v17, %v71_v27  ;;  %v75_v35 = vrot.slane %v1500_v23, 1  ;;  %v105_v37 = vsel %vm98_vm2, %v102_v16, %v104_v29  ;;  %v108_v46 = vrot.slane %v1495_v22, 2 }
  0x1b   :  { %v1287_v36 = vpack.i.bf16 %v72_v32, %v70_v26  ;;  %v107_v38 = vsel %vm98_vm2, %v104_v29, %v106_v30  ;;  %v140_v39 = vsel %vm133_vm1, %v137_v10, %v139_v31  ;;  %v142_v41 = vsel %vm133_vm1, %v139_v31, %v141_v33 }
  0x1c   :  { %v1292_v40 = vpack.i.bf16 %v107_v38, %v105_v37  ;;  %v74_v44 = vsel %vm63_vm0, %v71_v27, %v73_v34  ;;  %v76_v45 = vsel %vm63_vm0, %v73_v34, %v75_v35  ;;  %v110_v47 = vrot.slane %v1500_v23, 2  ;;  %v405_v37 = vld [vmem:[#allocation2 + $0x20] sm:$0xff] }
  0x1d   :  { %1278 = vrot.lane.b32.xlu0 %v1277_v28, %s1407_s22  ;;  %1288 = vrot.lane.b32.xlu1 %v1287_v36, %s1405_s16  ;;  %v1297_v48 = vpack.i.bf16 %v142_v41, %v140_v39  ;;  %v143_v49 = vrot.slane %v1495_v22, 3  ;;  %v145_v50 = vrot.slane %v1500_v23, 3  ;;  %v109_v51 = vsel %vm98_vm2, %v106_v30, %v108_v46  ;;  %v402_v36 = vld [vmem:[#allocation2 + $0x8] sm:$0xff] }
  0x1e   :  { %v111_v52 = vsel %vm98_vm2, %v108_v46, %v110_v47  ;;  %v77_v53 = vrot.slane %v1521_v42, 1  ;;  %v79_v54 = vrot.slane %v1526_v43, 1  ;;  %v1302_v55 = vpack.i.bf16 %v76_v45, %v74_v44 }
  0x1f   :  { %v144_v56 = vsel %vm133_vm1, %v141_v33, %v143_v49  ;;  %v146_v57 = vsel %vm133_vm1, %v143_v49, %v145_v50  ;;  %v112_v58 = vrot.slane %v1521_v42, 2  ;;  %v114_v59 = vrot.slane %v1526_v43, 2  ;;  %v1606_v49 = vld [vmem:[%s2041_s0 + $0x70] sm:$0xff] }
  0x20   :  { %v1307_v60 = vpack.i.bf16 %v111_v52, %v109_v51  ;;  %v78_v63 = vsel %vm63_vm0, %v75_v35, %v77_v53  ;;  %v80_v5 = vsel %vm63_vm0, %v77_v53, %v79_v54  ;;  %v147_v6 = vrot.slane %v1521_v42, 3 }
  0x21   :  { %1293 = vrot.lane.b32.xlu0 %v1292_v40, %s1407_s22  ;;  %1298 = vrot.lane.b32.xlu1 %v1297_v48, %s1406_s17  ;;  %v149_v9 = vrot.slane %v1526_v43, 3  ;;  %v1312_v10 = vpack.i.bf16 %v146_v57, %v144_v56  ;;  %v113_v12 = vsel %vm98_vm2, %v110_v47, %v112_v58  ;;  %v115_v14 = vsel %vm98_vm2, %v112_v58, %v114_v59  ;;  %v1601_v48 = vld [vmem:[%s2041_s0 + $0x68] sm:$0xff]  ;;  %v408_v58 = vld [vmem:[#allocation2 + $0x38] sm:$0xff] }
  0x22   :  { %v81_v15 = vrot.slane %v1549_v61, 1  ;;  %v83_v16 = vrot.slane %v1554_v62, 1  ;;  %v1317_v17 = vpack.i.bf16 %v80_v5, %v78_v63  ;;  %v148_v20 = vsel %vm133_vm1, %v145_v50, %v147_v6  ;;  %v401_v50 = vld [vmem:[#allocation2] sm:$0xff]  ;;  %v406_v56 = vld [vmem:[#allocation2 + $0x28] sm:$0xff] }
  0x23   :  { %v150_v21 = vsel %vm133_vm1, %v147_v6, %v149_v9  ;;  %v116_v24 = vrot.slane %v1549_v61, 2  ;;  %v118_v25 = vrot.slane %v1554_v62, 2  ;;  %v1322_v26 = vpack.i.bf16 %v115_v14, %v113_v12  ;;  %v409_v12 = vld [vmem:[#allocation2 + $0x40] sm:$0xff]  ;;  %v412_v14 = vld [vmem:[#allocation2 + $0x58] sm:$0xff] }
  0x24   :  { %v151_v27 = vrot.slane %v1549_v61, 3  ;;  %v153_v28 = vrot.slane %v1554_v62, 3  ;;  %v82_v29 = vsel %vm63_vm0, %v79_v54, %v81_v15  ;;  %v84_v30 = vsel %vm63_vm0, %v81_v15, %v83_v16  ;;  %v404_v54 = vld [vmem:[#allocation2 + $0x18] sm:$0xff] }
  0x25   :  { %1303 = vrot.lane.b32.xlu0 %v1302_v55, %s1405_s16  ;;  %1308 = vrot.lane.b32.xlu1 %v1307_v60, %s1407_s22  ;;  %v85_v31 = vrot.slane %v1569_v18, 1  ;;  %v87_v32 = vrot.slane %v1574_v19, 1  ;;  %v1327_v33 = vpack.i.bf16 %v150_v21, %v148_v20  ;;  %v117_v34 = vsel %vm98_vm2, %v114_v59, %v116_v24  ;;  %v403_v55 = vld [vmem:[#allocation2 + $0x10] sm:$0xff]  ;;  %v414_v21 = vld [vmem:[#allocation2 + $0x68] sm:$0xff] }
  0x26   :  { %v119_v35 = vsel %vm98_vm2, %v116_v24, %v118_v25  ;;  %v1332_v38 = vpack.i.bf16 %v84_v30, %v82_v29  ;;  %v152_v39 = vsel %vm133_vm1, %v149_v9, %v151_v27  ;;  %v154_v40 = vsel %vm133_vm1, %v151_v27, %v153_v28  ;;  %v411_v59 = vld [vmem:[#allocation2 + $0x50] sm:$0xff]  ;;  %v417_v24 = vld [vmem:[#allocation2 + $0x80] sm:$0xff] }
  0x27   :  { %v120_v41 = vrot.slane %v1569_v18, 2  ;;  %v86_v44 = vsel %vm63_vm0, %v83_v16, %v85_v31  ;;  %v88_v45 = vsel %vm63_vm0, %v85_v31, %v87_v32  ;;  %v122_v46 = vrot.slane %v1574_v19, 2  ;;  %v407_v60 = vld [vmem:[#allocation2 + $0x30] sm:$0xff] }
  0x28   :  { %v155_v47 = vrot.slane %v1569_v18, 3  ;;  %v1337_v51 = vpack.i.bf16 %v119_v35, %v117_v34  ;;  %v157_v52 = vrot.slane %v1574_v19, 3  ;;  %v1195_v53 = vpack.c.bf16 %v405_v37, %v402_v36  ;;  %v416_v36 = vld [vmem:[#allocation2 + $0x78] sm:$0xff]  ;;  %v415_v37 = vld [vmem:[#allocation2 + $0x70] sm:$0xff] }
  0x29   :  { %1313 = vrot.lane.b32.xlu0 %v1312_v10, %s1406_s17  ;;  %1318 = vrot.lane.b32.xlu1 %v1317_v17, %s1405_s16  ;;  %v1342_v57 = vpack.i.bf16 %v154_v40, %v152_v39  ;;  %v1347_v63 = vpack.i.bf16 %v88_v45, %v86_v44  ;;  %v121_v5 = vsel %vm98_vm2, %v118_v25, %v120_v41  ;;  %v89_v6 = vrot.slane %v1601_v48, 1  ;;  %v410_v10 = vld [vmem:[#allocation2 + $0x48] sm:$0xff]  ;;  %v423_v44 = vld [vmem:[#allocation2 + $0xb0] sm:$0xff] }
  0x2a   :  { %v91_v9 = vrot.slane %v1606_v49, 1  ;;  %1196 = vmatprep.subr.bf16.mxu0 %v1195_v53  ;;  %v123_v15 = vsel %vm98_vm2, %v120_v41, %v122_v46  ;;  %v156_v16 = vsel %vm133_vm1, %v153_v28, %v155_v47  ;;  %v1197_v17 = vpack.c.bf16 %v404_v54, %v401_v50  ;;  %v413_v28 = vld [vmem:[#allocation2 + $0x60] sm:$0xff]  ;;  %v420_v41 = vld [vmem:[#allocation2 + $0x98] sm:$0xff] }
  0x2b   :  { %v1236_v20 = vpack.c.bf16 %v406_v56, %v403_v55  ;;  %v158_v25 = vsel %vm133_vm1, %v155_v47, %v157_v52  ;;  %v126_v27 = vrot.slane %v1606_v49, 2  ;;  %v1199_v29 = vpack.c.bf16 %v411_v59, %v408_v58  ;;  %v1640_v54 = vld [vmem:[%s2041_s0 + $0x78] sm:$0xff]  ;;  %v422_v59 = vld [vmem:[#allocation2 + $0xa8] sm:$0xff] }
  0x2c   :  { %1198 = vmatpush1.bf16.msra.mxu0 %v1197_v17  ;;  %v1201_v30 = vpack.c.bf16 %v410_v10, %v407_v60  ;;  %v1239_v31 = vpack.c.bf16 %v412_v14, %v409_v12  ;;  %v90_v34 = vsel %vm63_vm0, %v87_v32, %v89_v6  ;;  %v1203_v35 = vpack.c.bf16 %v417_v24, %v414_v21  ;;  %v421_v60 = vld [vmem:[#allocation2 + $0xa0] sm:$0xff]  ;;  %v426_v10 = vld [vmem:[#allocation2 + $0xc8] sm:$0xff] }
  0x2d   :  { %1323 = vrot.lane.b32.xlu0 %v1322_v26, %s1407_s22  ;;  %1328 = vrot.lane.b32.xlu1 %v1327_v33, %s1406_s17  ;;  %v124_v26 = vrot.slane %v1601_v48, 2  ;;  %v1352_v33 = vpack.i.bf16 %v123_v15, %v121_v5  ;;  %vm168_vm3 = vcmask 1043456   ;;  %v1357_v39 = vpack.i.bf16 %v158_v25, %v156_v16  ;;  %v429_v12 = vld [vmem:[#allocation2 + $0xe0] sm:$0xff] }
  0x2e   :  { %1237 = vmatpush1.bf16.msra.mxu1 %v1236_v20  ;;  %1200 = vmatprep.subr.bf16.mxu0 %v1199_v29  ;;  %v92_v40 = vsel %vm63_vm0, %v89_v6, %v91_v9  ;;  %v169_v45 = vrot.slane %v1449_v1, 4  ;;  %v170_v32 = vrot.slane %v1454_v2, 4  ;;  %v161_v53 = vrot.slane %v1606_v49, 3  ;;  %v425_v25 = vld [vmem:[#allocation2 + $0xc0] sm:$0xff]  ;;  %v427_v29 = vld [vmem:[#allocation2 + $0xd0] sm:$0xff] }
  0x2f   :  { %1238 = vmatprep.subr.bf16.mxu1 %v1404_v0  ;;  %v125_v47 = vsel %vm98_vm2, %v122_v46, %v124_v26  ;;  %v127_v50 = vsel %vm98_vm2, %v124_v26, %v126_v27  ;;  %v1205_v55 = vpack.c.bf16 %v416_v36, %v413_v28  ;;  %v172_v46 = vrot.slane %v1459_v3, 4  ;;  %v428_v26 = vld [vmem:[#allocation2 + $0xd8] sm:$0xff] }
  0x30   :  { %1202 = vmatpush1.bf16.msra.mxu0 %v1201_v30  ;;  %v1207_v58 = vpack.c.bf16 %v423_v44, %v420_v41  ;;  %v1362_v5 = vpack.i.bf16 %v92_v40, %v90_v34  ;;  %v1367_v6 = vpack.i.bf16 %v127_v50, %v125_v47  ;;  %v171_v14 = vsel %vm168_vm3, %v169_v45, %v170_v32  ;;  %v430_v30 = vld [vmem:[#allocation2 + $0xe8] sm:$0xff]  ;;  %v432_v28 = vld [vmem:[#allocation2 + $0xf8] sm:$0xff]  ;;  %v433_v44 = vld [vmem:[#allocation2 + $0x100] sm:$0xff] }
  0x31   :  { %1333 = vrot.lane.b32.xlu0 %v1332_v38, %s1405_s16  ;;  %1338 = vrot.lane.b32.xlu1 %v1337_v51, %s1407_s22  ;;  %v418_v38 = vld [vmem:[#allocation2 + $0x88] sm:$0xff]  ;;  %v159_v51 = vrot.slane %v1601_v48, 3  ;;  %vm350_vm4 = vcmask 261120   ;;  %v1659_v17 = vsel %vm168_vm3, %v170_v32, %v172_v46  ;;  %v93_v20 = vrot.slane %v1640_v54, 1  ;;  %v436_v32 = vld [vmem:[#allocation2 + $0x118] sm:$0xff]  ;;  %v441_v50 = vld [vmem:[#allocation2 + $0x140] sm:$0xff] }
  0x32   :  { %1240 = vmatpush1.bf16.msra.mxu1 %v1239_v31  ;;  %v1242_v56 = vpack.c.bf16 %v418_v38, %v415_v37  ;;  %1204 = vmatprep.subr.bf16.mxu0 %v1203_v35  ;;  %v128_v34 = vrot.slane %v1640_v54, 2  ;;  %v163_v36 = vrot.slane %v1640_v54, 3  ;;  %v1213_v37 = vpack.c.bf16 %v428_v26, %v425_v25  ;;  %v434_v41 = vld [vmem:[#allocation2 + $0x108] sm:$0xff] }
  0x33   :  { %1241 = vmatprep.subr.bf16.mxu1 %v1404_v0  ;;  %v160_v15 = vsel %vm133_vm1, %v157_v52, %v159_v51  ;;  %v162_v16 = vsel %vm133_vm1, %v159_v51, %v161_v53  ;;  %1163 = vmatprep.mubr.msk.f32.mxu0 %vm350_vm4, %v171_v14  ;;  %v1211_v52 = vpack.c.bf16 %v429_v12, %v426_v10  ;;  %v438_v47 = vld [vmem:[#allocation2 + $0x128] sm:$0xff]  ;;  %vm367_vm5 = vcmask 523264  }
  0x34   :  { %1206 = vmatpush1.bf16.msra.mxu0 %v1205_v55  ;;  %v1372_v31 = vpack.i.bf16 %v162_v16, %v160_v15  ;;  %1179 = vmatprep.mubr.msk.f32.mxu1 %vm350_vm4, %v171_v14  ;;  %v94_v35 = vsel %vm63_vm0, %v91_v9, %v93_v20  ;;  %v1248_v38 = vpack.c.bf16 %v430_v30, %v427_v29  ;;  %v443_v14 = vld [vmem:[#allocation2 + $0x150] sm:$0xff]  ;;  %v446_v16 = vld [vmem:[#allocation2 + $0x168] sm:$0xff]  ;;  %v449_v29 = vld [vmem:[#allocation2 + $0x180] sm:$0xff]  ;;  %vm384_vm6 = vcmask 785408  }
  0x35   :  { %1343 = vrot.lane.b32.xlu0 %v1342_v57, %s1406_s17  ;;  %1348 = vrot.lane.b32.xlu1 %v1347_v63, %s1405_s16  ;;  %v419_v57 = vld [vmem:[#allocation2 + $0x90] sm:$0xff]  ;;  %v424_v63 = vld [vmem:[#allocation2 + $0xb8] sm:$0xff]  ;;  %v129_v9 = vsel %vm98_vm2, %v126_v27, %v128_v34  ;;  %v164_v51 = vsel %vm133_vm1, %v161_v53, %v163_v36  ;;  %v97_v53 = vsel %vm63_vm0, %v93_v20, %v64_v4  ;;  %v450_v25 = vld [vmem:[#allocation2 + $0x188] sm:$0xff]  ;;  %v198_v20 = vrot.slane %v1640_v54, 4 }
  0x36   :  { %1243 = vmatpush1.bf16.msra.mxu1 %v1242_v56  ;;  %v1209_v21 = vpack.c.bf16 %v422_v59, %v419_v57  ;;  %v1245_v24 = vpack.c.bf16 %v424_v63, %v421_v60  ;;  %1208 = vmatprep.subr.bf16.mxu0 %v1207_v58  ;;  %v1251_v56 = vpack.c.bf16 %v436_v32, %v433_v44  ;;  %v437_v57 = vld [vmem:[#allocation2 + $0x120] sm:$0xff]  ;;  %v440_v59 = vld [vmem:[#allocation2 + $0x138] sm:$0xff]  ;;  %v439_v60 = vld [vmem:[#allocation2 + $0x130] sm:$0xff]  ;;  %vm1104_vm13 = vcmask 1041409  }
  0x37   :  { %1244 = vmatprep.subr.bf16.mxu1 %v1404_v0  ;;  %v1219_v58 = vpack.c.bf16 %v441_v50, %v438_v47  ;;  %v442_v63 = vld [vmem:[#allocation2 + $0x148] sm:$0xff]  ;;  %v447_v27 = vld [vmem:[#allocation2 + $0x170] sm:$0xff]  ;;  %v1221_v10 = vpack.c.bf16 %v440_v59, %v437_v57  ;;  %v453_v4 = vld [vmem:[#allocation2 + $0x1a0] sm:$0xff]  ;;  %vm1107_vm14 = vcmask 1042434   ;;  %vm1110_vm15 = vcmask 1043459  }
  0x38   :  { %1210 = vmatpush1.bf16.msra.mxu0 %v1209_v21  ;;  %v1254_v12 = vpack.c.bf16 %v442_v63, %v439_v60  ;;  %v445_v21 = vld [vmem:[#allocation2 + $0x160] sm:$0xff]  ;;  %v1227_v30 = vpack.c.bf16 %v453_v4, %v450_v25  ;;  %v460_v44 = vld [vmem:[#allocation2 + $0x1d8] sm:$0xff]  ;;  %vm1113_vm0 = vcmask 1044484  }
  0x39   :  { %1353 = vrot.lane.b32.xlu0 %v1352_v33, %s1407_s22  ;;  %1358 = vrot.lane.b32.xlu1 %v1357_v39, %s1406_s17  ;;  %v435_v33 = vld [vmem:[#allocation2 + $0x110] sm:$0xff] }
  0x3a   :  { %1246 = vmatpush1.bf16.msra.mxu1 %v1245_v24  ;;  %v431_v39 = vld [vmem:[#allocation2 + $0xf0] sm:$0xff]  ;;  %1212 = vmatprep.subr.bf16.mxu0 %v1211_v52  ;;  %v1215_v40 = vpack.c.bf16 %v435_v33, %v432_v28  ;;  %v448_v24 = vld [vmem:[#allocation2 + $0x178] sm:$0xff]  ;;  %v1225_v52 = vpack.c.bf16 %v446_v16, %v443_v14  ;;  %v454_v33 = vld [vmem:[#allocation2 + $0x1a8] sm:$0xff] }
  0x3b   :  { %1247 = vmatprep.subr.bf16.mxu1 %v1404_v0  ;;  %v1217_v55 = vpack.c.bf16 %v434_v41, %v431_v39  ;;  %v1257_v26 = vpack.c.bf16 %v448_v24, %v445_v21  ;;  %v451_v28 = vld [vmem:[#allocation2 + $0x190] sm:$0xff]  ;;  %v457_v41 = vld [vmem:[#allocation2 + $0x1c0] sm:$0xff]  ;;  %v176_v21 = vrot.slane %v1477_v13, 4 }
  0x3c   :  { %1214 = vmatpush1.bf16.msra.mxu0 %v1213_v37  ;;  %v1260_v37 = vpack.c.bf16 %v454_v33, %v451_v28  ;;  %v1263_v32 = vpack.c.bf16 %v460_v44, %v457_v41 }
  0x3d   :  { %1363 = vrot.lane.b32.xlu0 %v1362_v5, %s1405_s16  ;;  %1368 = vrot.lane.b32.xlu1 %v1367_v6, %s1407_s22  ;;  %v444_v5 = vld [vmem:[#allocation2 + $0x158] sm:$0xff]  ;;  %v132_v6 = vsel %vm98_vm2, %v128_v34, %v99_v11  ;;  %v167_v11 = vsel %vm133_vm1, %v163_v36, %v134_v7  ;;  %v1702_v7 = vsel %vm168_vm3, %v198_v20, %v169_v45  ;;  %vm1116_vm1 = vcmask 1045509  }
  0x3e   :  { %1249 = vmatpush1.bf16.msra.mxu1 %v1248_v38  ;;  %1216 = vmatprep.subr.bf16.mxu0 %v1215_v40  ;;  %v1223_v15 = vpack.c.bf16 %v447_v27, %v444_v5  ;;  %v456_v34 = vld [vmem:[#allocation2 + $0x1b8] sm:$0xff]  ;;  %v455_v38 = vld [vmem:[#allocation2 + $0x1b0] sm:$0xff]  ;;  %v458_v40 = vld [vmem:[#allocation2 + $0x1c8] sm:$0xff]  ;;  %vm1119_vm2 = vcmask 1046534  }
  0x3f   :  { %1250 = vmatprep.subr.bf16.mxu1 %v1404_v0  ;;  %v1233_v45 = vpack.c.bf16 %v458_v40, %v455_v38  ;;  %v180_v38 = vrot.slane %v1500_v23, 4 }
  0x40   :  { %1218 = vmatpush1.bf16.msra.mxu0 %v1217_v55 }
  0x41   :  { %1373 = vrot.lane.b32.xlu0 %v1372_v31, %s1406_s17  ;;  %232 = vrot.lane.b32.xlu1 %v94_v35, %s1405_s16  ;;  %v452_v31 = vld [vmem:[#allocation2 + $0x198] sm:$0xff]  ;;  %v459_v35 = vld [vmem:[#allocation2 + $0x1d0] sm:$0xff] }
  0x42   :  { %1252 = vmatpush1.bf16.msra.mxu1 %v1251_v56  ;;  %1220 = vmatprep.subr.bf16.mxu0 %v1219_v58  ;;  %v1229_v36 = vpack.c.bf16 %v452_v31, %v449_v29  ;;  %v1231_v39 = vpack.c.bf16 %v459_v35, %v456_v34  ;;  %v178_v29 = vrot.slane %v1495_v22, 4 }
  0x43   :  { %1253 = vmatprep.subr.bf16.mxu1 %v1404_v0 }
  0x44   :  { %1222 = vmatpush1.bf16.msra.mxu0 %v1221_v10 }
  0x45   :  { %281 = vrot.lane.b32.xlu0 %v129_v9, %s1407_s22  ;;  %330 = vrot.lane.b32.xlu1 %v164_v51, %s1406_s17 }
  0x46   :  { %1255 = vmatpush1.bf16.msra.mxu1 %v1254_v12  ;;  %1224 = vmatprep.subr.bf16.mxu0 %v1223_v15 }
  0x47   :  { %1256 = vmatprep.subr.bf16.mxu1 %v1404_v0 }
  0x48   :  { %1226 = vmatpush1.bf16.msra.mxu0 %v1225_v52 }
  0x49   :  { %234 = vrot.lane.b32.xlu0 %v97_v53, %s1405_s16  ;;  %283 = vrot.lane.b32.xlu1 %v132_v6, %s1407_s22 }
  0x4a   :  { %1258 = vmatpush1.bf16.msra.mxu1 %v1257_v26  ;;  %1228 = vmatprep.subr.bf16.mxu0 %v1227_v30 }
  0x4b   :  { %1259 = vmatprep.subr.bf16.mxu1 %v1404_v0 }
  0x4c   :  { %1230 = vmatpush1.bf16.msra.mxu0 %v1229_v36 }
  0x4d   :  { %332 = vrot.lane.b32.xlu0 %v167_v11, %s1406_s17  ;;  %1232 = vmatprep.subr.bf16.mxu0 %v1231_v39 }
  0x4e   :  { %1261 = vmatpush1.bf16.msra.mxu1 %v1260_v37  ;;  %v179_v37 = vsel %vm168_vm3, %v176_v21, %v178_v29 }
  0x4f   :  { %1262 = vmatprep.subr.bf16.mxu1 %v1404_v0  ;;  %v174_v0 = vrot.slane %v1468_v8, 4 }
  0x50   :  { %1234 = vmatpush1.bf16.msra.mxu0 %v1233_v45 }
  0x52   :  { %1264 = vmatpush1.bf16.msra.mxu1 %v1263_v32 }
  0x8b   :  { %v1274_v47 = vpop.permute.xlu0 %1273  ;;  %v1284_v50 = vpop.permute.xlu1 %1283 }
  0x8c   :  { %v1275_v9 = vunpack.i.l.bf16 %v1274_v47  ;;  %v1276_v51 = vunpack.i.h.bf16 %v1274_v47  ;;  %v1285_v55 = vunpack.i.l.bf16 %v1284_v50  ;;  %v1286_v27 = vunpack.i.h.bf16 %v1284_v50 }
  0x8d   :  { %v181_v47 = vsel %vm168_vm3, %v178_v29, %v180_v38  ;;  %v182_v50 = vrot.slane %v1521_v42, 4 }
  0x8e   :  { %v351_v63 = vsel %vm350_vm4, %v1449_v1, %v1275_v9  ;;  %v352_v10 = vsel %vm350_vm4, %v1454_v2, %v1276_v51  ;;  %v175_v2 = vsel %vm168_vm3, %v172_v46, %v174_v0  ;;  %v177_v46 = vsel %vm168_vm3, %v174_v0, %v176_v21 }
  0x8f   :  { %v1279_v56 = vpop.permute.xlu0 %1278  ;;  %v1289_v59 = vpop.permute.xlu1 %1288 }
  0x90   :  { %v1281_v57 = vunpack.i.h.bf16 %v1279_v56  ;;  %v1280_v58 = vunpack.i.l.bf16 %v1279_v56  ;;  %v1290_v60 = vunpack.i.l.bf16 %v1289_v59  ;;  %v1291_v16 = vunpack.i.h.bf16 %v1289_v59 }
  0x92   :  { %v368_v5 = vsel %vm367_vm5, %v351_v63, %v1280_v58  ;;  %v369_v15 = vsel %vm367_vm5, %v352_v10, %v1281_v57  ;;  %v353_v1 = vsel %vm350_vm4, %v1459_v3, %v1290_v60  ;;  %v354_v3 = vsel %vm350_vm4, %v1468_v8, %v1291_v16 }
  0x93   :  { %v385_v53 = vsel %vm384_vm6, %v368_v5, %v1285_v55  ;;  %v1294_v6 = vpop.permute.xlu0 %1293  ;;  %v1299_v14 = vpop.permute.xlu1 %1298  ;;  %v386_v25 = vsel %vm384_vm6, %v369_v15, %v1286_v27  ;;  %v183_v60 = vsel %vm168_vm3, %v180_v38, %v182_v50  ;;  %v184_v63 = vrot.slane %v1526_v43, 4 }
  0x94   :  { %559 = vmatmul.mubr.f32.vlgmr.msra.gmra.mrb[0].mxu0 %v385_v53  ;;  %720 = vmatmul.mubr.f32.vlgmr.msra.gmra.mrb[0].mxu1 %v385_v53  ;;  %v1295_v12 = vunpack.i.l.bf16 %v1294_v6  ;;  %v1300_v24 = vunpack.i.l.bf16 %v1299_v14  ;;  %v1296_v11 = vunpack.i.h.bf16 %v1294_v6  ;;  %v1301_v30 = vunpack.i.h.bf16 %v1299_v14 }
  0x95   :  { %1164 = vmatprep.mubr.msk.f32.mxu0 %vm350_vm4, %v1659_v17  ;;  %1180 = vmatprep.mubr.msk.f32.mxu1 %vm350_vm4, %v1659_v17  ;;  %v186_v14 = vrot.slane %v1549_v61, 4 }
  0x96   :  { %v370_v52 = vsel %vm367_vm5, %v353_v1, %v1295_v12  ;;  %v371_v34 = vsel %vm367_vm5, %v354_v3, %v1296_v11  ;;  %v185_v12 = vsel %vm168_vm3, %v182_v50, %v184_v63  ;;  %v188_v11 = vrot.slane %v1554_v62, 4 }
  0x97   :  { %v1304_v4 = vpop.permute.xlu0 %1303  ;;  %v1309_v26 = vpop.permute.xlu1 %1308  ;;  %v387_v31 = vsel %vm384_vm6, %v370_v52, %v1300_v24  ;;  %v388_v40 = vsel %vm384_vm6, %v371_v34, %v1301_v30  ;;  %v194_v50 = vrot.slane %v1601_v48, 4 }
  0x98   :  { %565 = vmatmul.mubr.f32.gmra.mrb[2].mxu0 %v386_v25  ;;  %725 = vmatmul.mubr.f32.gmra.mrb[2].mxu1 %v386_v25  ;;  %v1305_v17 = vunpack.i.l.bf16 %v1304_v4  ;;  %v1310_v28 = vunpack.i.l.bf16 %v1309_v26  ;;  %v1306_v35 = vunpack.i.h.bf16 %v1304_v4  ;;  %v1311_v41 = vunpack.i.h.bf16 %v1309_v26 }
  0x99   :  { %1165 = vmatprep.mubr.msk.f32.mxu0 %vm350_vm4, %v175_v2  ;;  %1181 = vmatprep.mubr.msk.f32.mxu1 %vm350_vm4, %v175_v2  ;;  %v187_v4 = vsel %vm168_vm3, %v184_v63, %v186_v14  ;;  %v189_v30 = vsel %vm168_vm3, %v186_v14, %v188_v11 }
  0x9a   :  { %v355_v8 = vsel %vm350_vm4, %v1477_v13, %v1305_v17  ;;  %v356_v13 = vsel %vm350_vm4, %v1495_v22, %v1306_v35 }
  0x9b   :  { %v1314_v33 = vpop.permute.xlu0 %1313  ;;  %v1319_v36 = vpop.permute.xlu1 %1318  ;;  %v372_v44 = vsel %vm367_vm5, %v355_v8, %v1310_v28  ;;  %v373_v57 = vsel %vm367_vm5, %v356_v13, %v1311_v41 }
  0x9c   :  { %571 = vmatmul.mubr.f32.gmra.mrb[4].mxu0 %v387_v31  ;;  %730 = vmatmul.mubr.f32.gmra.mrb[4].mxu1 %v387_v31  ;;  %v1315_v39 = vunpack.i.l.bf16 %v1314_v33  ;;  %v1320_v32 = vunpack.i.l.bf16 %v1319_v36  ;;  %v1316_v9 = vunpack.i.h.bf16 %v1314_v33  ;;  %v1321_v58 = vunpack.i.h.bf16 %v1319_v36 }
  0x9d   :  { %1166 = vmatprep.mubr.msk.f32.mxu0 %vm350_vm4, %v177_v46  ;;  %1182 = vmatprep.mubr.msk.f32.mxu1 %vm350_vm4, %v177_v46  ;;  %v190_v31 = vrot.slane %v1569_v18, 4 }
  0x9e   :  { %v389_v51 = vsel %vm384_vm6, %v372_v44, %v1315_v39  ;;  %v357_v22 = vsel %vm350_vm4, %v1500_v23, %v1320_v32  ;;  %v390_v0 = vsel %vm384_vm6, %v373_v57, %v1316_v9  ;;  %v358_v23 = vsel %vm350_vm4, %v1521_v42, %v1321_v58 }
  0x9f   :  { %v1324_v45 = vpop.permute.xlu0 %1323  ;;  %v1329_v56 = vpop.permute.xlu1 %1328  ;;  %v191_v38 = vsel %vm168_vm3, %v188_v11, %v190_v31  ;;  %v192_v39 = vrot.slane %v1574_v19, 4 }
  0xa0   :  { %577 = vmatmul.mubr.f32.gmra.mrb[6].mxu0 %v388_v40  ;;  %735 = vmatmul.mubr.f32.gmra.mrb[6].mxu1 %v388_v40  ;;  %v1325_v55 = vunpack.i.l.bf16 %v1324_v45  ;;  %v1330_v5 = vunpack.i.l.bf16 %v1329_v56  ;;  %v1326_v27 = vunpack.i.h.bf16 %v1324_v45  ;;  %v1331_v15 = vunpack.i.h.bf16 %v1329_v56 }
  0xa1   :  { %1167 = vmatprep.mubr.msk.f32.mxu0 %vm350_vm4, %v179_v37  ;;  %1183 = vmatprep.mubr.msk.f32.mxu1 %vm350_vm4, %v179_v37 }
  0xa2   :  { %v374_v53 = vsel %vm367_vm5, %v357_v22, %v1325_v55  ;;  %v375_v21 = vsel %vm367_vm5, %v358_v23, %v1326_v27 }
  0xa3   :  { %v1334_v59 = vpop.permute.xlu0 %1333  ;;  %v1339_v6 = vpop.permute.xlu1 %1338  ;;  %v391_v16 = vsel %vm384_vm6, %v374_v53, %v1330_v5  ;;  %v392_v26 = vsel %vm384_vm6, %v375_v21, %v1331_v15 }
  0xa4   :  { %583 = vmatmul.mubr.f32.gmra.mrb[8].mxu0 %v389_v51  ;;  %740 = vmatmul.mubr.f32.gmra.mrb[8].mxu1 %v389_v51  ;;  %v1335_v10 = vunpack.i.l.bf16 %v1334_v59  ;;  %v1340_v1 = vunpack.i.l.bf16 %v1339_v6  ;;  %v1336_v24 = vunpack.i.h.bf16 %v1334_v59  ;;  %v1341_v17 = vunpack.i.h.bf16 %v1339_v6 }
  0xa5   :  { %1168 = vmatprep.mubr.msk.f32.mxu0 %vm350_vm4, %v181_v47  ;;  %1184 = vmatprep.mubr.msk.f32.mxu1 %vm350_vm4, %v181_v47  ;;  %v193_v47 = vsel %vm168_vm3, %v190_v31, %v192_v39  ;;  %v195_v59 = vsel %vm168_vm3, %v192_v39, %v194_v50 }
  0xa6   :  { %v359_v42 = vsel %vm350_vm4, %v1526_v43, %v1335_v10  ;;  %v360_v43 = vsel %vm350_vm4, %v1549_v61, %v1336_v24 }
  0xa7   :  { %v1344_v2 = vpop.permute.xlu0 %1343  ;;  %v1349_v25 = vpop.permute.xlu1 %1348  ;;  %v376_v3 = vsel %vm367_vm5, %v359_v42, %v1340_v1  ;;  %v377_v8 = vsel %vm367_vm5, %v360_v43, %v1341_v17 }
  0xa8   :  { %589 = vmatmul.mubr.f32.gmra.mrb[10].mxu0 %v390_v0  ;;  %745 = vmatmul.mubr.f32.gmra.mrb[10].mxu1 %v390_v0  ;;  %v1345_v52 = vunpack.i.l.bf16 %v1344_v2  ;;  %v1350_v29 = vunpack.i.l.bf16 %v1349_v25  ;;  %v1346_v28 = vunpack.i.h.bf16 %v1344_v2  ;;  %v1351_v36 = vunpack.i.h.bf16 %v1349_v25 }
  0xa9   :  { %1169 = vmatprep.mubr.msk.f32.mxu0 %vm350_vm4, %v183_v60  ;;  %1185 = vmatprep.mubr.msk.f32.mxu1 %vm350_vm4, %v183_v60  ;;  %v196_v60 = vrot.slane %v1606_v49, 4 }
  0xaa   :  { %v393_v33 = vsel %vm384_vm6, %v376_v3, %v1345_v52  ;;  %v361_v61 = vsel %vm350_vm4, %v1554_v62, %v1350_v29  ;;  %v394_v41 = vsel %vm384_vm6, %v377_v8, %v1346_v28  ;;  %v362_v62 = vsel %vm350_vm4, %v1569_v18, %v1351_v36 }
  0xab   :  { %v1354_v46 = vpop.permute.xlu0 %1353  ;;  %v1359_v35 = vpop.permute.xlu1 %1358  ;;  %v197_v6 = vsel %vm168_vm3, %v194_v50, %v196_v60 }
  0xac   :  { %595 = vmatmul.mubr.f32.gmra.mrb[12].mxu0 %v391_v16  ;;  %750 = vmatmul.mubr.f32.gmra.mrb[12].mxu1 %v391_v16  ;;  %v1355_v34 = vunpack.i.l.bf16 %v1354_v46  ;;  %v1360_v40 = vunpack.i.l.bf16 %v1359_v35  ;;  %v1356_v44 = vunpack.i.h.bf16 %v1354_v46  ;;  %v1361_v9 = vunpack.i.h.bf16 %v1359_v35 }
  0xad   :  { %1170 = vmatprep.mubr.msk.f32.mxu0 %vm350_vm4, %v185_v12  ;;  %1186 = vmatprep.mubr.msk.f32.mxu1 %vm350_vm4, %v185_v12 }
  0xae   :  { %v378_v45 = vsel %vm367_vm5, %v361_v61, %v1355_v34  ;;  %v379_v57 = vsel %vm367_vm5, %v362_v62, %v1356_v44 }
  0xaf   :  { %v1364_v37 = vpop.permute.xlu0 %1363  ;;  %v1369_v13 = vpop.permute.xlu1 %1368  ;;  %v395_v51 = vsel %vm384_vm6, %v378_v45, %v1360_v40  ;;  %v396_v5 = vsel %vm384_vm6, %v379_v57, %v1361_v9 }
  0xb0   :  { %601 = vmatmul.mubr.f32.gmra.mrb[14].mxu0 %v392_v26  ;;  %755 = vmatmul.mubr.f32.gmra.mrb[14].mxu1 %v392_v26  ;;  %v1365_v32 = vunpack.i.l.bf16 %v1364_v37  ;;  %v1370_v55 = vunpack.i.l.bf16 %v1369_v13  ;;  %v1366_v58 = vunpack.i.h.bf16 %v1364_v37  ;;  %v1371_v0 = vunpack.i.h.bf16 %v1369_v13  ;;  %v803_v26 = vld [vmem:[%s2044_s3] sm:$0x7] }
  0xb1   :  { %1171 = vmatprep.mubr.msk.f32.mxu0 %vm350_vm4, %v187_v4  ;;  %1187 = vmatprep.mubr.msk.f32.mxu1 %vm350_vm4, %v187_v4 }
  0xb2   :  { %v363_v18 = vsel %vm350_vm4, %v1574_v19, %v1365_v32  ;;  %v364_v19 = vsel %vm350_vm4, %v1601_v48, %v1366_v58  ;;  %v199_v48 = vsel %vm168_vm3, %v196_v60, %v198_v20  ;;  %v800_v20 = vlaneseq }
  0xb3   :  { %v1374_v56 = vpop.permute.xlu0 %1373  ;;  %v233_v22 = vpop.permute.xlu1 %232  ;;  %v380_v53 = vsel %vm367_vm5, %v363_v18, %v1370_v55  ;;  %v381_v14 = vsel %vm367_vm5, %v364_v19, %v1371_v0  ;;  %vm1122_vm3 = vcmask 1047559  }
  0xb4   :  { %607 = vmatmul.mubr.f32.gmra.mrb[16].mxu0 %v393_v33  ;;  %760 = vmatmul.mubr.f32.gmra.mrb[16].mxu1 %v393_v33  ;;  %v1375_v63 = vunpack.i.l.bf16 %v1374_v56  ;;  %v1376_v10 = vunpack.i.h.bf16 %v1374_v56  ;;  %v365_v15 = vsel %vm350_vm4, %v1606_v49, %v233_v22  ;;  %v1834_v4 = vshrl.u32 %v800_v20, 7 }
  0xb5   :  { %1172 = vmatprep.mubr.msk.f32.mxu0 %vm350_vm4, %v189_v30  ;;  %1188 = vmatprep.mubr.msk.f32.mxu1 %vm350_vm4, %v189_v30 }
  0xb6   :  { %v397_v23 = vsel %vm384_vm6, %v380_v53, %v1375_v63  ;;  %v398_v1 = vsel %vm384_vm6, %v381_v14, %v1376_v10  ;;  %v806_v11 = vsub.s32 0, %v1834_v4  ;;  %v814_v52 = vsub.s32 2, %v1834_v4 }
  0xb7   :  { %v282_v27 = vpop.permute.xlu0 %281  ;;  %v331_v12 = vpop.permute.xlu1 %330  ;;  %v810_v17 = vsub.s32 1, %v1834_v4  ;;  %v802_v46 = vadd.s32 8, %v1834_v4 }
  0xb8   :  { %613 = vmatmul.mubr.f32.gmra.mrb[18].mxu0 %v394_v41  ;;  %765 = vmatmul.mubr.f32.gmra.mrb[18].mxu1 %v394_v41  ;;  %v382_v2 = vsel %vm367_vm5, %v365_v15, %v282_v27  ;;  %v815_v3 = vrot.slane %v803_v26, %v814_v52 }
  0xb9   :  { %1173 = vmatprep.mubr.msk.f32.mxu0 %vm350_vm4, %v191_v38  ;;  %1189 = vmatprep.mubr.msk.f32.mxu1 %vm350_vm4, %v191_v38  ;;  %v399_v49 = vsel %vm384_vm6, %v382_v2, %v331_v12  ;;  %v811_v29 = vrot.slane %v803_v26, %v810_v17 }
  0xba   :  { %vm1855_vm8 = vcmp.lt.s32.totalorder %v1834_v4, %v815_v3  ;;  %vm1863_vm10 = vcmp.lt.s32.totalorder %v802_v46, %v815_v3 }
  0xbb   :  { %v235_v16 = vpop.permute.xlu0 %234  ;;  %v284_v24 = vpop.permute.xlu1 %283  ;;  %vm1868_vm11 = vcmp.lt.s32.totalorder %v1834_v4, %v811_v29  ;;  %vm1872_vm12 = vcmp.lt.s32.totalorder %v802_v46, %v811_v29 }
  0xbc   :  { %619 = vmatmul.mubr.f32.gmra.mrb[20].mxu0 %v395_v51  ;;  %770 = vmatmul.mubr.f32.gmra.mrb[20].mxu1 %v395_v51  ;;  %v366_v21 = vsel %vm350_vm4, %v1640_v54, %v235_v16  ;;  %v1038_v16 = vld [vmem:[%s2043_s2] sm:$0x7] }
  0xbd   :  { %1174 = vmatprep.mubr.msk.f32.mxu0 %vm350_vm4, %v193_v47  ;;  %1190 = vmatprep.mubr.msk.f32.mxu1 %vm350_vm4, %v193_v47  ;;  %v383_v42 = vsel %vm367_vm5, %v366_v21, %v284_v24 }
  0xbf   :  { %v333_v25 = vpop.permute.xlu0 %332 }
  0xc0   :  { %625 = vmatmul.mubr.f32.gmra.mrb[22].mxu0 %v396_v5  ;;  %775 = vmatmul.mubr.f32.gmra.mrb[22].mxu1 %v396_v5  ;;  %v400_v54 = vsel %vm384_vm6, %v383_v42, %v333_v25 }
  0xc1   :  { %1175 = vmatprep.mubr.msk.f32.mxu0 %vm350_vm4, %v195_v59  ;;  %1191 = vmatprep.mubr.msk.f32.mxu1 %vm350_vm4, %v195_v59 }
  0xc4   :  { %631 = vmatmul.mubr.f32.gmra.mrb[24].mxu0 %v397_v23  ;;  %780 = vmatmul.mubr.f32.gmra.mrb[24].mxu1 %v397_v23 }
  0xc5   :  { %1176 = vmatprep.mubr.msk.f32.mxu0 %vm350_vm4, %v197_v6  ;;  %1192 = vmatprep.mubr.msk.f32.mxu1 %vm350_vm4, %v197_v6 }
  0xc8   :  { %637 = vmatmul.mubr.f32.gmra.mrb[26].mxu0 %v398_v1  ;;  %785 = vmatmul.mubr.f32.gmra.mrb[26].mxu1 %v398_v1 }
  0xc9   :  { %1177 = vmatprep.mubr.msk.f32.mxu0 %vm350_vm4, %v199_v48  ;;  %1193 = vmatprep.mubr.msk.f32.mxu1 %vm350_vm4, %v199_v48 }
  0xcc   :  { %643 = vmatmul.mubr.f32.gmra.mrb[28].mxu0 %v399_v49  ;;  %790 = vmatmul.mubr.f32.gmra.mrb[28].mxu1 %v399_v49 }
  0xcd   :  { %1178 = vmatprep.mubr.msk.f32.mxu0 %vm350_vm4, %v1702_v7  ;;  %1194 = vmatprep.mubr.msk.f32.mxu1 %vm350_vm4, %v1702_v7  ;;  %v807_v7 = vrot.slane %v803_v26, %v806_v11 }
  0xcf   :  { %vm1850_vm7 = vcmp.lt.s32.totalorder %v1834_v4, %v807_v7  ;;  %vm1859_vm9 = vcmp.lt.s32.totalorder %v802_v46, %v807_v7  ;;  %v1905_v46 = vrot.slane %v1038_v16, %v806_v11 }
  0xd0   :  { %649 = vmatmul.mubr.f32.gmra.mrb[30].mxu0 %v400_v54  ;;  %795 = vmatmul.mubr.f32.gmra.mrb[30].mxu1 %v400_v54 }
 0x167   :  { %v560_v43 = vpop.f32.mrb[0].mxu0  ;;  %v721_v30 = vpop.f32.mrb[0].mxu1 }
 0x168   :  { %v562_v31 = vpop.f32.mrb[1].mxu0  ;;  %v723_v28 = vpop.f32.mrb[1].mxu1  ;;  %v822_v39 = vsel %vm1850_vm7, %v560_v43, -inf  ;;  %v824_v40 = vsel %vm1855_vm8, %v721_v30, -inf }
 0x169   :  { %v823_v13 = vsel %vm1868_vm11, %v562_v31, -inf  ;;  %v1909_v28 = vrot.slane %v1038_v16, %v814_v52 }
 0x16b   :  { %v566_v37 = vpop.f32.mrb[2].mxu0  ;;  %v726_v38 = vpop.f32.mrb[2].mxu1 }
 0x16c   :  { %v825_v41 = vsel %vm1859_vm9, %v566_v37, -inf  ;;  %v827_v44 = vsel %vm1863_vm10, %v726_v38, -inf  ;;  %v568_v45 = vpop.f32.mrb[3].mxu0  ;;  %v728_v32 = vpop.f32.mrb[3].mxu1  ;;  %v1913_v37 = vrot.slane %v1038_v16, %v810_v17 }
 0x16d   :  { %v870_v62 = vmax.f32 %v822_v39, %v825_v41  ;;  %v884_v47 = vmax.f32 %v824_v40, %v827_v44  ;;  %v826_v50 = vsel %vm1872_vm12, %v568_v45, -inf }
 0x16e   :  { %v877_v9 = vmax.f32 %v823_v13, %v826_v50 }
 0x16f   :  { %v871_v51 = vrot.slane %v870_v62, 4  ;;  %v885_v55 = vrot.slane %v884_v47, 4  ;;  %v572_v56 = vpop.f32.mrb[4].mxu0  ;;  %v731_v57 = vpop.f32.mrb[4].mxu1 }
 0x170   :  { %v878_v58 = vrot.slane %v877_v9, 4  ;;  %v574_v22 = vpop.f32.mrb[5].mxu0  ;;  %v733_v18 = vpop.f32.mrb[5].mxu1  ;;  %v828_v27 = vsel %vm1850_vm7, %v572_v56, -inf  ;;  %v830_v10 = vsel %vm1855_vm8, %v731_v57, -inf }
 0x171   :  { %v872_v59 = vmax.f32 %v870_v62, %v871_v51  ;;  %v886_v60 = vmax.f32 %v884_v47, %v885_v55  ;;  %v829_v49 = vsel %vm1868_vm11, %v574_v22, -inf }
 0x172   :  { %v879_v63 = vmax.f32 %v877_v9, %v878_v58 }
 0x173   :  { %v873_v5 = vrot.slane %v872_v59, 2  ;;  %v887_v0 = vrot.slane %v886_v60, 2  ;;  %v578_v53 = vpop.f32.mrb[6].mxu0  ;;  %v736_v19 = vpop.f32.mrb[6].mxu1 }
 0x174   :  { %v880_v6 = vrot.slane %v879_v63, 2  ;;  %v831_v23 = vsel %vm1859_vm9, %v578_v53, -inf  ;;  %v833_v12 = vsel %vm1863_vm10, %v736_v19, -inf  ;;  %v580_v14 = vpop.f32.mrb[7].mxu0  ;;  %v738_v15 = vpop.f32.mrb[7].mxu1 }
 0x175   :  { %v874_v48 = vmax.f32 %v872_v59, %v873_v5  ;;  %v888_v1 = vmax.f32 %v886_v60, %v887_v0  ;;  %v891_v2 = vmax.f32 %v828_v27, %v831_v23  ;;  %v905_v21 = vmax.f32 %v830_v10, %v833_v12 }
 0x176   :  { %v881_v24 = vmax.f32 %v879_v63, %v880_v6  ;;  %v832_v42 = vsel %vm1872_vm12, %v580_v14, -inf }
 0x177   :  { %v875_v25 = vrot.slane %v874_v48, 1  ;;  %v889_v54 = vrot.slane %v888_v1, 1  ;;  %v892_v20 = vrot.slane %v891_v2, 4  ;;  %v906_v26 = vrot.slane %v905_v21, 4  ;;  %v584_v7 = vpop.f32.mrb[8].mxu0  ;;  %v741_v3 = vpop.f32.mrb[8].mxu1 }
 0x178   :  { %v882_v29 = vrot.slane %v881_v24, 1  ;;  %v898_v43 = vmax.f32 %v829_v49, %v832_v42  ;;  %v586_v30 = vpop.f32.mrb[9].mxu0  ;;  %v743_v31 = vpop.f32.mrb[9].mxu1  ;;  %v834_v11 = vsel %vm1850_vm7, %v584_v7, -inf  ;;  %v836_v62 = vsel %vm1855_vm8, %v741_v3, -inf }
 0x179   :  { %v893_v38 = vmax.f32 %v891_v2, %v892_v20  ;;  %v907_v39 = vmax.f32 %v905_v21, %v906_v26  ;;  %v876_v40 = vmax.f32 %v874_v48, %v875_v25  ;;  %v890_v41 = vmax.f32 %v888_v1, %v889_v54 }
 0x17a   :  { %v899_v44 = vrot.slane %v898_v43, 4  ;;  %v883_v45 = vmax.f32 %v881_v24, %v882_v29  ;;  %v835_v17 = vsel %vm1868_vm11, %v586_v30, -inf }
 0x17b   :  { %v894_v32 = vrot.slane %v893_v38, 2  ;;  %v908_v13 = vrot.slane %v907_v39, 2  ;;  %v590_v52 = vpop.f32.mrb[10].mxu0  ;;  %v746_v47 = vpop.f32.mrb[10].mxu1  ;;  %v1055_v18 = vadd.f32 %v1905_v46, %v876_v40  ;;  %v1057_v59 = vadd.f32 %v1909_v28, %v890_v41 }
 0x17c   :  { %v900_v4 = vmax.f32 %v898_v43, %v899_v44  ;;  %v837_v50 = vsel %vm1859_vm9, %v590_v52, -inf  ;;  %v839_v9 = vsel %vm1863_vm10, %v746_v47, -inf  ;;  %v592_v51 = vpop.f32.mrb[11].mxu0  ;;  %v748_v55 = vpop.f32.mrb[11].mxu1  ;;  %v1056_v10 = vadd.f32 %v1913_v37, %v883_v45 }
 0x17d   :  { %v895_v56 = vmax.f32 %v893_v38, %v894_v32  ;;  %v909_v57 = vmax.f32 %v907_v39, %v908_v13  ;;  %v912_v58 = vmax.f32 %v834_v11, %v837_v50  ;;  %v926_v22 = vmax.f32 %v836_v62, %v839_v9 }
 0x17e   :  { %v901_v60 = vrot.slane %v900_v4, 2  ;;  %v838_v63 = vsel %vm1872_vm12, %v592_v51, -inf }
 0x17f   :  { %v896_v5 = vrot.slane %v895_v56, 1  ;;  %v910_v0 = vrot.slane %v909_v57, 1  ;;  %v913_v27 = vrot.slane %v912_v58, 4  ;;  %v927_v53 = vrot.slane %v926_v22, 4  ;;  %v596_v19 = vpop.f32.mrb[12].mxu0  ;;  %v751_v6 = vpop.f32.mrb[12].mxu1 }
 0x180   :  { %v902_v23 = vmax.f32 %v900_v4, %v901_v60  ;;  %v919_v12 = vmax.f32 %v835_v17, %v838_v63  ;;  %v840_v14 = vsel %vm1850_vm7, %v596_v19, -inf  ;;  %v598_v15 = vpop.f32.mrb[13].mxu0  ;;  %v753_v16 = vpop.f32.mrb[13].mxu1  ;;  %v842_v42 = vsel %vm1855_vm8, %v751_v6, -inf }
 0x181   :  { %v897_v48 = vmax.f32 %v895_v56, %v896_v5  ;;  %v911_v1 = vmax.f32 %v909_v57, %v910_v0  ;;  %v914_v2 = vmax.f32 %v912_v58, %v913_v27  ;;  %v928_v21 = vmax.f32 %v926_v22, %v927_v53 }
 0x182   :  { %v903_v24 = vrot.slane %v902_v23, 1  ;;  %v920_v49 = vrot.slane %v919_v12, 4  ;;  %v841_v25 = vsel %vm1868_vm11, %v598_v15, -inf }
 0x183   :  { %v1058_v54 = vadd.f32 %v1905_v46, %v897_v48  ;;  %v1060_v20 = vadd.f32 %v1909_v28, %v911_v1  ;;  %v915_v26 = vrot.slane %v914_v2, 2  ;;  %v929_v7 = vrot.slane %v928_v21, 2  ;;  %v602_v3 = vpop.f32.mrb[14].mxu0  ;;  %v756_v29 = vpop.f32.mrb[14].mxu1 }
 0x184   :  { %v904_v43 = vmax.f32 %v902_v23, %v903_v24  ;;  %v921_v30 = vmax.f32 %v919_v12, %v920_v49  ;;  %v843_v31 = vsel %vm1859_vm9, %v602_v3, -inf  ;;  %v845_v38 = vsel %vm1863_vm10, %v756_v29, -inf  ;;  %v604_v39 = vpop.f32.mrb[15].mxu0  ;;  %v758_v40 = vpop.f32.mrb[15].mxu1 }
 0x185   :  { %v1103_v41 = vrot.slane %v1058_v54, 7  ;;  %v1138_v44 = vrot.slane %v1060_v20, 7  ;;  %v916_v11 = vmax.f32 %v914_v2, %v915_v26  ;;  %v930_v45 = vmax.f32 %v928_v21, %v929_v7 }
 0x186   :  { %v1059_v32 = vadd.f32 %v1913_v37, %v904_v43  ;;  %v922_v13 = vrot.slane %v921_v30, 2  ;;  %v933_v62 = vmax.f32 %v840_v14, %v843_v31  ;;  %v947_v52 = vmax.f32 %v842_v42, %v845_v38 }
 0x187   :  { %v1105_v47 = vsel %vm1104_vm13, %v1103_v41, %v1055_v18  ;;  %v1139_v4 = vsel %vm1104_vm13, %v1138_v44, %v1057_v59  ;;  %v917_v17 = vrot.slane %v916_v11, 1  ;;  %v931_v50 = vrot.slane %v930_v45, 1  ;;  %v608_v9 = vpop.f32.mrb[16].mxu0  ;;  %v761_v51 = vpop.f32.mrb[16].mxu1 }
 0x188   :  { %v1124_v55 = vrot.slane %v1059_v32, 7  ;;  %v923_v56 = vmax.f32 %v921_v30, %v922_v13  ;;  %v934_v57 = vrot.slane %v933_v62, 4  ;;  %v948_v58 = vrot.slane %v947_v52, 4  ;;  %v610_v22 = vpop.f32.mrb[17].mxu0  ;;  %v763_v60 = vpop.f32.mrb[17].mxu1 }
 0x189   :  { %v918_v63 = vmax.f32 %v916_v11, %v917_v17  ;;  %v932_v5 = vmax.f32 %v930_v45, %v931_v50  ;;  %v844_v0 = vsel %vm1872_vm12, %v604_v39, -inf  ;;  %v846_v18 = vsel %vm1850_vm7, %v608_v9, -inf }
 0x18a   :  { %v1125_v59 = vsel %vm1104_vm13, %v1124_v55, %v1056_v10  ;;  %v924_v27 = vrot.slane %v923_v56, 1  ;;  %v935_v53 = vmax.f32 %v933_v62, %v934_v57  ;;  %v949_v19 = vmax.f32 %v947_v52, %v948_v58 }
 0x18b   :  { %v1061_v6 = vadd.f32 %v1905_v46, %v918_v63  ;;  %v1063_v23 = vadd.f32 %v1909_v28, %v932_v5  ;;  %v940_v12 = vmax.f32 %v841_v25, %v844_v0  ;;  %v848_v14 = vsel %vm1855_vm8, %v761_v51, -inf  ;;  %v614_v15 = vpop.f32.mrb[18].mxu0  ;;  %v766_v16 = vpop.f32.mrb[18].mxu1 }
 0x18c   :  { %v925_v48 = vmax.f32 %v923_v56, %v924_v27  ;;  %v936_v1 = vrot.slane %v935_v53, 2  ;;  %v950_v2 = vrot.slane %v949_v19, 2  ;;  %v847_v21 = vsel %vm1868_vm11, %v610_v22, -inf  ;;  %v616_v10 = vpop.f32.mrb[19].mxu0  ;;  %v768_v24 = vpop.f32.mrb[19].mxu1 }
 0x18d   :  { %v1106_v49 = vrot.slane %v1061_v6, 6  ;;  %v1140_v42 = vrot.slane %v1063_v23, 6  ;;  %v941_v54 = vrot.slane %v940_v12, 4  ;;  %v849_v25 = vsel %vm1859_vm9, %v614_v15, -inf }
 0x18e   :  { %v1062_v20 = vadd.f32 %v1913_v37, %v925_v48  ;;  %v937_v26 = vmax.f32 %v935_v53, %v936_v1  ;;  %v951_v7 = vmax.f32 %v949_v19, %v950_v2  ;;  %v954_v3 = vmax.f32 %v846_v18, %v849_v25 }
 0x18f   :  { %v1108_v29 = vsel %vm1107_vm14, %v1106_v49, %v1105_v47  ;;  %v1141_v43 = vsel %vm1107_vm14, %v1140_v42, %v1139_v4  ;;  %v942_v30 = vmax.f32 %v940_v12, %v941_v54  ;;  %v851_v31 = vsel %vm1863_vm10, %v766_v16, -inf  ;;  %v620_v38 = vpop.f32.mrb[20].mxu0  ;;  %v771_v39 = vpop.f32.mrb[20].mxu1 }
 0x190   :  { %v1126_v40 = vrot.slane %v1062_v20, 6  ;;  %v938_v41 = vrot.slane %v937_v26, 1  ;;  %v952_v44 = vrot.slane %v951_v7, 1  ;;  %v955_v11 = vrot.slane %v954_v3, 4  ;;  %v622_v45 = vpop.f32.mrb[21].mxu0  ;;  %v773_v32 = vpop.f32.mrb[21].mxu1 }
 0x191   :  { %v943_v13 = vrot.slane %v942_v30, 2  ;;  %v968_v62 = vmax.f32 %v848_v14, %v851_v31  ;;  %v850_v52 = vsel %vm1872_vm12, %v616_v10, -inf  ;;  %v852_v47 = vsel %vm1850_vm7, %v620_v38, -inf }
 0x192   :  { %v1127_v4 = vsel %vm1107_vm14, %v1126_v40, %v1125_v59  ;;  %v939_v17 = vmax.f32 %v937_v26, %v938_v41  ;;  %v953_v50 = vmax.f32 %v951_v7, %v952_v44  ;;  %v956_v9 = vmax.f32 %v954_v3, %v955_v11 }
 0x193   :  { %v944_v51 = vmax.f32 %v942_v30, %v943_v13  ;;  %v969_v55 = vrot.slane %v968_v62, 4  ;;  %v961_v56 = vmax.f32 %v847_v21, %v850_v52  ;;  %v854_v57 = vsel %vm1855_vm8, %v771_v39, -inf  ;;  %v626_v58 = vpop.f32.mrb[22].mxu0  ;;  %v776_v22 = vpop.f32.mrb[22].mxu1 }
 0x194   :  { %v1064_v60 = vadd.f32 %v1905_v46, %v939_v17  ;;  %v1066_v63 = vadd.f32 %v1909_v28, %v953_v50  ;;  %v957_v5 = vrot.slane %v956_v9, 2  ;;  %v853_v0 = vsel %vm1868_vm11, %v622_v45, -inf  ;;  %v628_v18 = vpop.f32.mrb[23].mxu0  ;;  %v778_v59 = vpop.f32.mrb[23].mxu1 }
 0x195   :  { %v945_v27 = vrot.slane %v944_v51, 1  ;;  %v970_v53 = vmax.f32 %v968_v62, %v969_v55  ;;  %v962_v19 = vrot.slane %v961_v56, 4  ;;  %v855_v6 = vsel %vm1859_vm9, %v626_v58, -inf }
 0x196   :  { %v1109_v23 = vrot.slane %v1064_v60, 5  ;;  %v1142_v12 = vrot.slane %v1066_v63, 5  ;;  %v958_v14 = vmax.f32 %v956_v9, %v957_v5  ;;  %v975_v15 = vmax.f32 %v852_v47, %v855_v6 }
 0x197   :  { %v946_v16 = vmax.f32 %v944_v51, %v945_v27  ;;  %v971_v48 = vrot.slane %v970_v53, 2  ;;  %v963_v1 = vmax.f32 %v961_v56, %v962_v19  ;;  %v857_v2 = vsel %vm1863_vm10, %v776_v22, -inf  ;;  %v632_v21 = vpop.f32.mrb[24].mxu0  ;;  %v781_v10 = vpop.f32.mrb[24].mxu1 }
 0x198   :  { %v1111_v24 = vsel %vm1110_vm15, %v1109_v23, %v1108_v29  ;;  %v1143_v49 = vsel %vm1110_vm15, %v1142_v12, %v1141_v43  ;;  %v959_v42 = vrot.slane %v958_v14, 1  ;;  %v976_v54 = vrot.slane %v975_v15, 4  ;;  %v1980_v25 = vpop.f32.mrb[25].mxu0  ;;  %v783_v20 = vpop.f32.mrb[25].mxu1 }
 0x199   :  { %v1065_v26 = vadd.f32 %v1913_v37, %v946_v16  ;;  %v972_v7 = vmax.f32 %v970_v53, %v971_v48  ;;  %v964_v3 = vrot.slane %v963_v1, 2  ;;  %v989_v30 = vmax.f32 %v854_v57, %v857_v2 }
 0x19a   :  { %v960_v31 = vmax.f32 %v958_v14, %v959_v42  ;;  %v977_v38 = vmax.f32 %v975_v15, %v976_v54  ;;  %v856_v39 = vsel %vm1872_vm12, %v628_v18, -inf  ;;  %v858_v29 = vsel %vm1850_vm7, %v632_v21, -inf }
 0x19b   :  { %v1128_v40 = vrot.slane %v1065_v26, 5  ;;  %v973_v43 = vrot.slane %v972_v7, 1  ;;  %v965_v41 = vmax.f32 %v963_v1, %v964_v3  ;;  %v990_v44 = vrot.slane %v989_v30, 4  ;;  %v638_v11 = vpop.f32.mrb[26].mxu0  ;;  %v786_v45 = vpop.f32.mrb[26].mxu1 }
 0x19c   :  { %v1067_v32 = vadd.f32 %v1905_v46, %v960_v31  ;;  %v978_v13 = vrot.slane %v977_v38, 2  ;;  %v982_v62 = vmax.f32 %v853_v0, %v856_v39  ;;  %v860_v52 = vsel %vm1855_vm8, %v781_v10, -inf  ;;  %v640_v47 = vpop.f32.mrb[27].mxu0  ;;  %v788_v17 = vpop.f32.mrb[27].mxu1 }
 0x19d   :  { %v1129_v50 = vsel %vm1110_vm15, %v1128_v40, %v1127_v4  ;;  %v974_v9 = vmax.f32 %v972_v7, %v973_v43  ;;  %v966_v51 = vrot.slane %v965_v41, 1  ;;  %v991_v55 = vmax.f32 %v989_v30, %v990_v44 }
 0x19e   :  { %v1112_v56 = vrot.slane %v1067_v32, 4  ;;  %v979_v57 = vmax.f32 %v977_v38, %v978_v13  ;;  %v983_v58 = vrot.slane %v982_v62, 4  ;;  %v859_v22 = vsel %vm1868_vm11, %v1980_v25, -inf }
 0x19f   :  { %v1069_v60 = vadd.f32 %v1909_v28, %v974_v9  ;;  %v967_v63 = vmax.f32 %v965_v41, %v966_v51  ;;  %v992_v5 = vrot.slane %v991_v55, 2  ;;  %v861_v0 = vsel %vm1859_vm9, %v638_v11, -inf  ;;  %v644_v18 = vpop.f32.mrb[28].mxu0  ;;  %v791_v4 = vpop.f32.mrb[28].mxu1 }
 0x1a0   :  { %v1114_v59 = vsel %vm1113_vm0, %v1112_v56, %v1111_v24  ;;  %v980_v27 = vrot.slane %v979_v57, 1  ;;  %v984_v53 = vmax.f32 %v982_v62, %v983_v58  ;;  %v996_v19 = vmax.f32 %v858_v29, %v861_v0  ;;  %v646_v6 = vpop.f32.mrb[29].mxu0  ;;  %v793_v23 = vpop.f32.mrb[29].mxu1 }
 0x1a1   :  { %v1144_v12 = vrot.slane %v1069_v60, 4  ;;  %v1068_v14 = vadd.f32 %v1913_v37, %v967_v63  ;;  %v993_v15 = vmax.f32 %v991_v55, %v992_v5  ;;  %v863_v16 = vsel %vm1863_vm10, %v786_v45, -inf }
 0x1a2   :  { %v981_v48 = vmax.f32 %v979_v57, %v980_v27  ;;  %v985_v1 = vrot.slane %v984_v53, 2  ;;  %v997_v2 = vrot.slane %v996_v19, 4  ;;  %v1010_v21 = vmax.f32 %v860_v52, %v863_v16 }
 0x1a3   :  { %v1145_v10 = vsel %vm1113_vm0, %v1144_v12, %v1143_v49  ;;  %v1130_v42 = vrot.slane %v1068_v14, 4  ;;  %v994_v24 = vrot.slane %v993_v15, 1  ;;  %v862_v54 = vsel %vm1872_vm12, %v640_v47, -inf  ;;  %v650_v25 = vpop.f32.mrb[30].mxu0  ;;  %v796_v20 = vpop.f32.mrb[30].mxu1 }
 0x1a4   :  { %v1070_v26 = vadd.f32 %v1905_v46, %v981_v48  ;;  %v986_v7 = vmax.f32 %v984_v53, %v985_v1  ;;  %v998_v3 = vmax.f32 %v996_v19, %v997_v2  ;;  %v1011_v30 = vrot.slane %v1010_v21, 4  ;;  %v652_v31 = vpop.f32.mrb[31].mxu0  ;;  %v798_v38 = vpop.f32.mrb[31].mxu1 }
 0x1a5   :  { %v1131_v39 = vsel %vm1113_vm0, %v1130_v42, %v1129_v50  ;;  %v995_v29 = vmax.f32 %v993_v15, %v994_v24  ;;  %v1003_v40 = vmax.f32 %v859_v22, %v862_v54  ;;  %v864_v49 = vsel %vm1850_vm7, %v644_v18, -inf }
 0x1a6   :  { %v1115_v43 = vrot.slane %v1070_v26, 3  ;;  %v987_v41 = vrot.slane %v986_v7, 1  ;;  %v999_v44 = vrot.slane %v998_v3, 2  ;;  %v1012_v11 = vmax.f32 %v1010_v21, %v1011_v30 }
 0x1a7   :  { %v1072_v45 = vadd.f32 %v1909_v28, %v995_v29  ;;  %v1004_v32 = vrot.slane %v1003_v40, 4  ;;  %v866_v13 = vsel %vm1855_vm8, %v791_v4, -inf  ;;  %v865_v62 = vsel %vm1868_vm11, %v646_v6, -inf }
 0x1a8   :  { %v1117_v52 = vsel %vm1116_vm1, %v1115_v43, %v1114_v59  ;;  %v988_v47 = vmax.f32 %v986_v7, %v987_v41  ;;  %v1000_v17 = vmax.f32 %v998_v3, %v999_v44  ;;  %v1013_v50 = vrot.slane %v1012_v11, 2 }
 0x1a9   :  { %v1146_v33 = vrot.slane %v1072_v45, 3  ;;  %v1005_v9 = vmax.f32 %v1003_v40, %v1004_v32  ;;  %v867_v51 = vsel %vm1859_vm9, %v650_v25, -inf  ;;  %v869_v55 = vsel %vm1863_vm10, %v796_v20, -inf }
 0x1aa   :  { %v1071_v56 = vadd.f32 %v1913_v37, %v988_v47  ;;  %v1001_v34 = vrot.slane %v1000_v17, 1  ;;  %v1014_v57 = vmax.f32 %v1012_v11, %v1013_v50  ;;  %v1017_v58 = vmax.f32 %v864_v49, %v867_v51 }
 0x1ab   :  { %v1147_v36 = vsel %vm1116_vm1, %v1146_v33, %v1145_v10  ;;  %v1006_v22 = vrot.slane %v1005_v9, 2  ;;  %v1031_v60 = vmax.f32 %v866_v13, %v869_v55  ;;  %v868_v63 = vsel %vm1872_vm12, %v652_v31, -inf }
 0x1ac   :  { %v1132_v5 = vrot.slane %v1071_v56, 3  ;;  %v1002_v0 = vmax.f32 %v1000_v17, %v1001_v34  ;;  %v1015_v18 = vrot.slane %v1014_v57, 1  ;;  %v1018_v35 = vrot.slane %v1017_v58, 4 }
 0x1ad   :  { %v1007_v4 = vmax.f32 %v1005_v9, %v1006_v22  ;;  %v1032_v59 = vrot.slane %v1031_v60, 4  ;;  %v1024_v8 = vmax.f32 %v865_v62, %v868_v63 }
 0x1ae   :  { %v1133_v27 = vsel %vm1116_vm1, %v1132_v5, %v1131_v39  ;;  %v1073_v53 = vadd.f32 %v1905_v46, %v1002_v0  ;;  %v1016_v19 = vmax.f32 %v1014_v57, %v1015_v18  ;;  %v1019_v6 = vmax.f32 %v1017_v58, %v1018_v35 }
 0x1af   :  { %v1008_v23 = vrot.slane %v1007_v4, 1  ;;  %v1033_v12 = vmax.f32 %v1031_v60, %v1032_v59  ;;  %v1025_v14 = vrot.slane %v1024_v8, 4 }
 0x1b0   :  { %v1118_v15 = vrot.slane %v1073_v53, 2  ;;  %v1075_v61 = vadd.f32 %v1909_v28, %v1016_v19  ;;  %v1020_v16 = vrot.slane %v1019_v6, 2 }
 0x1b1   :  { %v1009_v48 = vmax.f32 %v1007_v4, %v1008_v23  ;;  %v1034_v1 = vrot.slane %v1033_v12, 2  ;;  %v1026_v2 = vmax.f32 %v1024_v8, %v1025_v14 }
 0x1b2   :  { %v1120_v21 = vsel %vm1119_vm2, %v1118_v15, %v1117_v52  ;;  %v1148_v10 = vrot.slane %v1075_v61, 2  ;;  %v1021_v42 = vmax.f32 %v1019_v6, %v1020_v16 }
 0x1b3   :  { %v1074_v24 = vadd.f32 %v1913_v37, %v1009_v48  ;;  %v1035_v54 = vmax.f32 %v1033_v12, %v1034_v1  ;;  %v1027_v25 = vrot.slane %v1026_v2, 2 }
 0x1b4   :  { %v1149_v20 = vsel %vm1119_vm2, %v1148_v10, %v1147_v36  ;;  %v1022_v26 = vrot.slane %v1021_v42, 1 }
 0x1b5   :  { %v1134_v7 = vrot.slane %v1074_v24, 2  ;;  %v1036_v3 = vrot.slane %v1035_v54, 1  ;;  %v1028_v30 = vmax.f32 %v1026_v2, %v1027_v25 }
 0x1b6   :  { %v1023_v31 = vmax.f32 %v1021_v42, %v1022_v26 }
 0x1b7   :  { %v1135_v38 = vsel %vm1119_vm2, %v1134_v7, %v1133_v27  ;;  %v1037_v39 = vmax.f32 %v1035_v54, %v1036_v3  ;;  %v1029_v29 = vrot.slane %v1028_v30, 1 }
 0x1b8   :  { %v1076_v40 = vadd.f32 %v1905_v46, %v1023_v31 }
 0x1b9   :  { %v1078_v49 = vadd.f32 %v1909_v28, %v1037_v39  ;;  %v1030_v43 = vmax.f32 %v1028_v30, %v1029_v29 }
 0x1ba   :  { %v1121_v41 = vrot.slane %v1076_v40, 1 }
 0x1bb   :  { %v1150_v44 = vrot.slane %v1078_v49, 1  ;;  %v1077_v11 = vadd.f32 %v1913_v37, %v1030_v43 }
 0x1bc   :  { %v1123_v45 = vsel %vm1122_vm3, %v1121_v41, %v1120_v21 }
 0x1bd   :  { %1155 = vst [vmem:[%s2045_s4] sm:$0xff] %v1123_v45  ;;  %v1151_v32 = vsel %vm1122_vm3, %v1150_v44, %v1149_v20  ;;  %v1136_v13 = vrot.slane %v1077_v11, 1 }
 0x1be   :  { %1157 = vst [vmem:[%s2045_s4 + $0x10] sm:$0xff] %v1151_v32 }
 0x1bf   :  { %v1137_v46 = vsel %vm1122_vm3, %v1136_v13, %v1135_v38 }
 0x1c0   :  { %1156 = vst [vmem:[%s2045_s4 + $0x8] sm:$0xff] %v1137_v46 }
 0x1c1   :  { %1162 = vsyncpa [#allocation3], 1 }

</bundles_post_ra>
